<compile_context>
chip_gen: v7x
topology: tpu7x:2x2x1
jax: 0.10.0
libtpu: 0.0.40
codegen_flags: <defaults>
</compile_context>

<pallas_src>
import math

import jax
import jax.numpy as jnp
from jax.experimental import pallas as pl
from jax.experimental.pallas import tpu as pltpu

# ----------------------------- model hyperparams -----------------------------
N_NODES = 64    # number of graph nodes
M_IN    = 16    # input feature dim (m)
HIDDEN  = 32    # hidden dim
M_OUT   = 8     # output dim (m_y)
LANE    = 128   # lane-dense padding target for all feature dims


# --------------------------------- kernel ------------------------------------
def gcn_kernel(x_ref, adj_ref, w1_ref, b1_ref, w2_ref, b2_ref, out_ref):
    # ---- GCNConv #1: A_hat @ (X @ W1) + b1, then ReLU ------------------------
    h = jnp.dot(x_ref[...], w1_ref[...], preferred_element_type=jnp.float32)
    h = jnp.dot(adj_ref[...], h, preferred_element_type=jnp.float32) + b1_ref[...]
    h = jnp.maximum(h, 0.0)
    # F.dropout(p=0.5) is identity in eval mode.

    # ---- GCNConv #2: A_hat @ (h @ W2) + b2 -----------------------------------
    y = jnp.dot(h, w2_ref[...], preferred_element_type=jnp.float32)
    y = jnp.dot(adj_ref[...], y, preferred_element_type=jnp.float32) + b2_ref[...]
    out_ref[...] = y


# --------------------------------- wrapper -----------------------------------
def _pad2(a, rows, cols):
    return jnp.pad(a, ((0, rows - a.shape[0]), (0, cols - a.shape[1])))


def gcn_forward(x, adj, w1, b1, w2, b2):
    """x:[N,m], adj:[N,N], w1:[m,hidden], b1:[1,hidden], w2:[hidden,m_y], b2:[1,m_y]."""
    n, m = x.shape
    hidden = w1.shape[1]
    m_y = w2.shape[1]
    assert max(m, hidden, m_y) <= LANE

    # Zero-pad all feature dims to a lane-dense 128 so every vreg is fully used
    # and the output store is unmasked. Zero rows/cols keep results exact.
    x_p  = _pad2(x,  n,    LANE)
    w1_p = _pad2(w1, LANE, LANE)
    b1_p = _pad2(b1, 1,    LANE)
    w2_p = _pad2(w2, LANE, LANE)
    b2_p = _pad2(b2, 1,    LANE)

    vmem = pl.BlockSpec(memory_space=pltpu.MemorySpace.VMEM)  # whole array in VMEM
    out_p = pl.pallas_call(
        gcn_kernel,
        out_shape=jax.ShapeDtypeStruct((n, LANE), jnp.float32),
        in_specs=[vmem, vmem, vmem, vmem, vmem, vmem],
        out_specs=vmem,
        compiler_params=pltpu.CompilerParams(vmem_limit_bytes=64 * 1024 * 1024),
    )(x_p, adj, w1_p, b1_p, w2_p, b2_p)
    return out_p[:, :m_y]


# ------------------------------ glue / helpers --------------------------------
def build_norm_adj(edge_index, n):
    """Dense D^{-1/2}(A + I)D^{-1/2} (gcn_norm with self-loops)."""
    src, dst = edge_index
    a = jnp.zeros((n, n), jnp.float32).at[dst, src].set(1.0)
    a = jnp.maximum(a, a.T)          # treat graph as undirected
    a = a + jnp.eye(n, dtype=jnp.float32)
    deg = a.sum(axis=1)
    d_inv_sqrt = 1.0 / jnp.sqrt(deg)
    return a * d_inv_sqrt[:, None] * d_inv_sqrt[None, :]


def ref_forward(x, adj, w1, b1, w2, b2):
    """Pure-JAX reference of the PyTorch forward (eval mode)."""
    h = adj @ (x @ w1) + b1
    h = jax.nn.relu(h)
    # dropout: identity in eval mode
    return adj @ (h @ w2) + b2


# ----------------------------------- main -------------------------------------
if __name__ == "__main__":
    key = jax.random.PRNGKey(0)
    k_x, k_e, k_w1, k_b1, k_w2, k_b2 = jax.random.split(key, 6)

    # node features
    x = jax.random.normal(k_x, (N_NODES, M_IN), dtype=jnp.float32)

    # deterministic edge_index: a ring plus a few random chords (undirected)
    idx = jnp.arange(N_NODES)
    ring_src = jnp.concatenate([idx, (idx + 1) % N_NODES])
    ring_dst = jnp.concatenate([(idx + 1) % N_NODES, idx])
    chords = jax.random.randint(k_e, (2, 32), 0, N_NODES)
    edge_index = jnp.stack([
        jnp.concatenate([ring_src, chords[0], chords[1]]),
        jnp.concatenate([ring_dst, chords[1], chords[0]]),
    ])
    adj = build_norm_adj(edge_index, N_NODES)

    # parameters (nn.Linear inside GCNConv stores W as [out, in]; pre-transposed here)
    w1 = jax.random.uniform(k_w1, (M_IN, HIDDEN), jnp.float32,
                            -1.0 / math.sqrt(M_IN), 1.0 / math.sqrt(M_IN))
    b1 = jax.random.uniform(k_b1, (1, HIDDEN), jnp.float32,
                            -1.0 / math.sqrt(M_IN), 1.0 / math.sqrt(M_IN))
    w2 = jax.random.uniform(k_w2, (HIDDEN, M_OUT), jnp.float32,
                            -1.0 / math.sqrt(HIDDEN), 1.0 / math.sqrt(HIDDEN))
    b2 = jax.random.uniform(k_b2, (1, M_OUT), jnp.float32,
                            -1.0 / math.sqrt(HIDDEN), 1.0 / math.sqrt(HIDDEN))

    out = gcn_forward(x, adj, w1, b1, w2, b2)
    out = jax.block_until_ready(out)

    ref = ref_forward(x, adj, w1, b1, w2, b2)
    assert out.shape == (N_NODES, M_OUT)
    assert jnp.allclose(out, ref, rtol=1e-4, atol=1e-4), "mismatch vs JAX reference"

    print("KERNEL_OK")
</pallas_src>

<mosaic_0001>
module attributes {stable_mosaic.version = 11 : i64} {
  func.func @gcn_kernel(%arg0: memref<64x128xf32, #tpu.memory_space<vmem>>, %arg1: memref<64x64xf32, #tpu.memory_space<vmem>>, %arg2: memref<128x128xf32, #tpu.memory_space<vmem>>, %arg3: memref<1x128xf32, #tpu.memory_space<vmem>>, %arg4: memref<128x128xf32, #tpu.memory_space<vmem>>, %arg5: memref<1x128xf32, #tpu.memory_space<vmem>>, %arg6: memref<64x128xf32, #tpu.memory_space<vmem>>) attributes {dimension_semantics = [], scalar_prefetch = 0 : i64, scratch_operands = 0 : i64, tpu.core_type = #tpu.core_type<tc>} {
    %c0 = arith.constant 0 : index
    %c0_0 = arith.constant 0 : index
    %0 = vector.load %arg0[%c0, %c0_0] : memref<64x128xf32, #tpu.memory_space<vmem>>, vector<64x128xf32>
    %c0_1 = arith.constant 0 : index
    %c0_2 = arith.constant 0 : index
    %1 = vector.load %arg2[%c0_1, %c0_2] : memref<128x128xf32, #tpu.memory_space<vmem>>, vector<128x128xf32>
    %cst = arith.constant dense<0.000000e+00> : vector<64x128xf32>
    %2 = tpu.matmul %0, %1, %cst {dimension_numbers = #tpu.dot_dimension_numbers<[1], [0], [0], [1], [0, 0, 1, 1], [], []>} : vector<64x128xf32>, vector<128x128xf32>, vector<64x128xf32> -> vector<64x128xf32>
    %c0_3 = arith.constant 0 : index
    %c0_4 = arith.constant 0 : index
    %3 = vector.load %arg1[%c0_3, %c0_4] : memref<64x64xf32, #tpu.memory_space<vmem>>, vector<64x64xf32>
    %cst_5 = arith.constant dense<0.000000e+00> : vector<64x128xf32>
    %4 = tpu.matmul %3, %2, %cst_5 {dimension_numbers = #tpu.dot_dimension_numbers<[1], [0], [0], [1], [0, 0, 1, 1], [], []>} : vector<64x64xf32>, vector<64x128xf32>, vector<64x128xf32> -> vector<64x128xf32>
    %c0_6 = arith.constant 0 : index
    %c0_7 = arith.constant 0 : index
    %5 = vector.load %arg3[%c0_6, %c0_7] : memref<1x128xf32, #tpu.memory_space<vmem>>, vector<1x128xf32>
    %6 = vector.broadcast %5 : vector<1x128xf32> to vector<64x128xf32>
    %7 = arith.addf %4, %6 : vector<64x128xf32>
    %cst_8 = arith.constant 0.000000e+00 : f32
    %8 = vector.broadcast %cst_8 : f32 to vector<64x128xf32>
    %9 = arith.maximumf %7, %8 : vector<64x128xf32>
    %c0_9 = arith.constant 0 : index
    %c0_10 = arith.constant 0 : index
    %10 = vector.load %arg4[%c0_9, %c0_10] : memref<128x128xf32, #tpu.memory_space<vmem>>, vector<128x128xf32>
    %cst_11 = arith.constant dense<0.000000e+00> : vector<64x128xf32>
    %11 = tpu.matmul %9, %10, %cst_11 {dimension_numbers = #tpu.dot_dimension_numbers<[1], [0], [0], [1], [0, 0, 1, 1], [], []>} : vector<64x128xf32>, vector<128x128xf32>, vector<64x128xf32> -> vector<64x128xf32>
    %c0_12 = arith.constant 0 : index
    %c0_13 = arith.constant 0 : index
    %12 = vector.load %arg1[%c0_12, %c0_13] : memref<64x64xf32, #tpu.memory_space<vmem>>, vector<64x64xf32>
    %cst_14 = arith.constant dense<0.000000e+00> : vector<64x128xf32>
    %13 = tpu.matmul %12, %11, %cst_14 {dimension_numbers = #tpu.dot_dimension_numbers<[1], [0], [0], [1], [0, 0, 1, 1], [], []>} : vector<64x64xf32>, vector<64x128xf32>, vector<64x128xf32> -> vector<64x128xf32>
    %c0_15 = arith.constant 0 : index
    %c0_16 = arith.constant 0 : index
    %14 = vector.load %arg5[%c0_15, %c0_16] : memref<1x128xf32, #tpu.memory_space<vmem>>, vector<1x128xf32>
    %15 = vector.broadcast %14 : vector<1x128xf32> to vector<64x128xf32>
    %16 = arith.addf %13, %15 : vector<64x128xf32>
    %c0_17 = arith.constant 0 : index
    %c0_18 = arith.constant 0 : index
    %17 = vector.load %arg6[%c0_17, %c0_18] : memref<64x128xf32, #tpu.memory_space<vmem>>, vector<64x128xf32>
    tpu.vector_store %arg6[%c0_17, %c0_18], %16 {strides = array<i32>} : memref<64x128xf32, #tpu.memory_space<vmem>>, vector<64x128xf32>,
    return
  }
}

</mosaic_0001>

<bundles_post_ra>
// kernel: tpu_custom_call.1
= control target key start
LH: loop header
LB: loop body
LE: loop exit
PB: predicated region body
PF: predicated region fallthrough
CT: control target
= control target key end

     0   :  { %11 = vsyncpa [#allocation3], 0  ;;  %s1358_s0 = inlined_call_operand.hbm [shape: f32[64,128], index: 0, kind: input, shape index: {}]   ;;  %s1359_s1 = inlined_call_operand.hbm [shape: f32[64,64], index: 1, kind: input, shape index: {}]   ;;  %s1360_s2 = inlined_call_operand.hbm [shape: f32[128,128], index: 2, kind: input, shape index: {}]   ;;  %s1361_s3 = inlined_call_operand.hbm [shape: f32[1,128], index: 3, kind: input, shape index: {}]   ;;  %s1362_s4 = inlined_call_operand.hbm [shape: f32[128,128], index: 4, kind: input, shape index: {}]   ;;  %s1363_s5 = inlined_call_operand.hbm [shape: f32[1,128], index: 5, kind: input, shape index: {}]   ;;  %s1364_s6 = inlined_call_operand.hbm [shape: f32[64,128], index: 6, kind: output, shape index: {}]  }
   0x1   :  { %12 = vsyncpa [#allocation6], 0 }
   0x2   :  { %13 = vsyncpa [#allocation9], 0 }
   0x3   :  { %14 = vsyncpa [#allocation12], 0 }
   0x4   :  { %15 = vsyncpa [#allocation4], 0  ;;  %s1156_s21 = smov [#allocation5]   ;;  %s1157_s23 = smov [#allocation8]  }
   0x5   :  { %s33_s22 = sshll.u32 %s1156_s21, 4  ;;  %s58_s24 = sshll.u32 %s1157_s23, 4  ;;  %s34_s22 = int_to_ptr.vmem [resolvable:$true] %s33_s22  ;;  %s1200_s24 = int_to_ptr.vmem [resolvable:$true] %s58_s24 }
   0x6   :  { %s992_s27 = scalar_lea.hbm %s1359_s1, 1024 }
   0x7   :  { %p993_p0 = scmp.ne.s32.totalorder %s1359_s1, %s992_s27  ;;  %p996_p1 = scmp.lt.u32.totalorder %s992_s27, %s1359_s1 }
   0x9   :  { %p998_p2 = pnand %p996_p1, %p993_p0 }
   0xb   :  { %1001 = shalt.err (!%p998_p2)
}
   0xc   :  { %s1002_s8 = scalar_lea.vmem %s34_s22, 1024  ;;  %p1007_p4 = scmp.lt.s32.totalorder %s34_s22, %s34_s22 }
   0xd   :  { %p1003_p3 = scmp.ne.s32.totalorder %s34_s22, %s1002_s8  ;;  %p1008_p5 = scmp.lt.s32.totalorder %s1002_s8, %s1002_s8 }
   0xf   :  { %p1009_p6 = por %p1008_p5, %p1007_p4 }
  0x11   :  { %p1010_p7 = pnand %p1009_p6, %p1003_p3 }
  0x13   :  { %1013 = shalt.err (!%p1010_p7)
}
  0x14   :  { %s1158_s9 = smov 128   ;;  %s1159_s10 = smov 8  }
  0x15   :  { %39 = dma.hbm_to_vmem [thread:$0]  %s1359_s1, 1024, %s34_s22, [#allocation6], %s1158_s9, %s1158_s9, %s1159_s10  }
  0x16   :  { %s1014_s15 = scalar_lea.hbm %s1361_s3, 16 }
  0x17   :  { %p1015_p8 = scmp.ne.s32.totalorder %s1361_s3, %s1014_s15  ;;  %p1018_p9 = scmp.lt.u32.totalorder %s1014_s15, %s1361_s3 }
  0x19   :  { %p1020_p10 = pnand %p1018_p9, %p1015_p8 }
  0x1b   :  { %1023 = shalt.err (!%p1020_p10)
}
  0x1c   :  { %s1024_s20 = scalar_lea.vmem %s1200_s24, 16  ;;  %s1028_s1 = scalar_lea.vmem %s1200_s24, 32 }
  0x1d   :  { %p1025_p11 = scmp.ne.s32.totalorder %s1200_s24, %s1024_s20  ;;  %p1029_p12 = scmp.lt.s32.totalorder %s1200_s24, %s1200_s24 }
  0x1e   :  { %p1030_p13 = scmp.lt.s32.totalorder %s1028_s1, %s1024_s20 }
  0x20   :  { %p1031_p0 = por %p1030_p13, %p1029_p12 }
  0x22   :  { %p1032_p1 = pnand %p1031_p0, %p1025_p11 }
  0x24   :  { %1035 = shalt.err (!%p1032_p1)
}
  0x25   :  { %61 = dma.hbm_to_vmem [thread:$0]  %s1361_s3, 16, %s1200_s24, [#allocation9]  }
  0x26   :  { %s1160_s23 = smov [#allocation2]   ;;  %s1161_s26 = smov [#allocation7]  }
  0x27   :  { %s21_s25 = sshll.u32 %s1160_s23, 4  ;;  %s45_s27 = sshll.u32 %s1161_s26, 4  ;;  %s22_s25 = int_to_ptr.vmem [resolvable:$true] %s21_s25  ;;  %s1235_s27 = int_to_ptr.vmem [resolvable:$true] %s45_s27 }
  0x28   :  { %s1036_s30 = scalar_lea.hbm %s1358_s0, 1024 }
  0x29   :  { %p1037_p2 = scmp.ne.s32.totalorder %s1358_s0, %s1036_s30  ;;  %p1040_p3 = scmp.lt.u32.totalorder %s1036_s30, %s1358_s0 }
  0x2b   :  { %p1042_p4 = pnand %p1040_p3, %p1037_p2 }
  0x2d   :  { %1045 = shalt.err (!%p1042_p4)
}
  0x2e   :  { %s1046_s3 = scalar_lea.vmem %s22_s25, 1024  ;;  %p1051_p6 = scmp.lt.s32.totalorder %s22_s25, %s22_s25 }
  0x2f   :  { %p1047_p5 = scmp.ne.s32.totalorder %s22_s25, %s1046_s3  ;;  %p1052_p7 = scmp.lt.s32.totalorder %s1046_s3, %s1046_s3 }
  0x31   :  { %p1053_p8 = por %p1052_p7, %p1051_p6 }
  0x33   :  { %p1054_p9 = pnand %p1053_p8, %p1047_p5 }
  0x35   :  { %1057 = shalt.err (!%p1054_p9)
}
  0x36   :  { %27 = dma.hbm_to_vmem [thread:$0]  %s1358_s0, 1024, %s22_s25, [#allocation3], %s1158_s9, %s1158_s9, %s1159_s10  }
  0x37   :  { %s1058_s16 = scalar_lea.hbm %s1360_s2, 2048 }
  0x38   :  { %p1059_p10 = scmp.ne.s32.totalorder %s1360_s2, %s1058_s16  ;;  %p1062_p11 = scmp.lt.u32.totalorder %s1058_s16, %s1360_s2 }
  0x3a   :  { %p1064_p12 = pnand %p1062_p11, %p1059_p10 }
  0x3c   :  { %1067 = shalt.err (!%p1064_p12)
}
  0x3d   :  { %s1068_s1 = scalar_lea.vmem %s1235_s27, 2048  ;;  %p1073_p0 = scmp.lt.s32.totalorder %s1235_s27, %s1235_s27 }
  0x3e   :  { %p1069_p13 = scmp.ne.s32.totalorder %s1235_s27, %s1068_s1  ;;  %p1074_p1 = scmp.lt.s32.totalorder %s1068_s1, %s1068_s1 }
  0x40   :  { %p1075_p2 = por %p1074_p1, %p1073_p0 }
  0x42   :  { %p1076_p3 = pnand %p1075_p2, %p1069_p13 }
  0x44   :  { %1079 = shalt.err (!%p1076_p3)
}
  0x45   :  { %51 = dma.hbm_to_vmem [thread:$0]  %s1360_s2, 2048, %s1235_s27, [#allocation6], %s1158_s9, %s1158_s9, %s1159_s10  }
  0x46   :  { %s1162_s22 = smov [#allocation10]   ;;  %s1163_s25 = smov [#allocation11]  }
  0x47   :  { %s67_s23 = sshll.u32 %s1162_s22, 4  ;;  %s80_s26 = sshll.u32 %s1163_s25, 4  ;;  %s68_s23 = int_to_ptr.vmem [resolvable:$true] %s67_s23  ;;  %s81_s26 = int_to_ptr.vmem [resolvable:$true] %s80_s26 }
  0x48   :  { %s1080_s30 = scalar_lea.hbm %s1362_s4, 2048 }
  0x49   :  { %p1081_p4 = scmp.ne.s32.totalorder %s1362_s4, %s1080_s30  ;;  %p1084_p5 = scmp.lt.u32.totalorder %s1080_s30, %s1362_s4 }
  0x4b   :  { %p1086_p6 = pnand %p1084_p5, %p1081_p4 }
  0x4d   :  { %1089 = shalt.err (!%p1086_p6)
}
  0x4e   :  { %s1090_s2 = scalar_lea.vmem %s68_s23, 2048  ;;  %p1095_p8 = scmp.lt.s32.totalorder %s68_s23, %s68_s23 }
  0x4f   :  { %p1091_p7 = scmp.ne.s32.totalorder %s68_s23, %s1090_s2  ;;  %p1096_p9 = scmp.lt.s32.totalorder %s1090_s2, %s1090_s2 }
  0x51   :  { %p1097_p10 = por %p1096_p9, %p1095_p8 }
  0x53   :  { %p1098_p11 = pnand %p1097_p10, %p1091_p7 }
  0x55   :  { %1101 = shalt.err (!%p1098_p11)
}
  0x56   :  { %73 = dma.hbm_to_vmem [thread:$0]  %s1362_s4, 2048, %s68_s23, [#allocation9], %s1158_s9, %s1158_s9, %s1159_s10  }
  0x57   :  { %s1102_s14 = scalar_lea.hbm %s1363_s5, 16 }
  0x58   :  { %p1103_p12 = scmp.ne.s32.totalorder %s1363_s5, %s1102_s14  ;;  %p1106_p13 = scmp.lt.u32.totalorder %s1102_s14, %s1363_s5 }
  0x5a   :  { %p1108_p0 = pnand %p1106_p13, %p1103_p12 }
  0x5c   :  { %1111 = shalt.err (!%p1108_p0)
}
  0x5d   :  { %s1112_s19 = scalar_lea.vmem %s81_s26, 16  ;;  %s1116_s20 = scalar_lea.vmem %s81_s26, 32 }
  0x5e   :  { %p1113_p1 = scmp.ne.s32.totalorder %s81_s26, %s1112_s19  ;;  %p1117_p2 = scmp.lt.s32.totalorder %s81_s26, %s81_s26 }
  0x5f   :  { %p1118_p3 = scmp.lt.s32.totalorder %s1116_s20, %s1112_s19 }
  0x61   :  { %p1119_p4 = por %p1118_p3, %p1117_p2 }
  0x63   :  { %p1120_p5 = pnand %p1119_p4, %p1113_p1 }
  0x65   :  { %1123 = shalt.err (!%p1120_p5)
}
  0x66   :  { %83 = dma.hbm_to_vmem [thread:$0]  %s1363_s5, 16, %s81_s26, [#allocation12]  }
  0x67   :  { %1146 = dma.done.wait [#allocation3], 1024  }
  0x68   :  { %1147 = vsyncadd [#allocation3], 4294966272 }
  0x69   :  { %1148 = dma.done.wait [#allocation6], 3072  }
  0x6a   :  { %1149 = vsyncadd [#allocation6], 4294964224 }
  0x6b   :  { %1150 = dma.done.wait [#allocation9], 2064  }
  0x6c   :  { %1151 = vsyncadd [#allocation9], 4294965232 }
  0x6d   :  { %1152 = dma.done.wait [#allocation12], 16  }
  0x6e   :  { %1153 = vsyncadd [#allocation12], 4294967280  ;;  %v110_v0 = vld [vmem:[#allocation7] sm:$0xff]  ;;  %v111_v1 = vld [vmem:[#allocation7 + $0x8] sm:$0xff]  ;;  %vm246_vm0 = vcmask 523264   ;;  %s1164_s5 = smov [#allocation13]  }
  0x6f   :  { %v112_v2 = vld [vmem:[#allocation7 + $0x10] sm:$0xff]  ;;  %v887_v3 = vpack.c.bf16 %v111_v1, %v110_v0  ;;  %v113_v4 = vld [vmem:[#allocation7 + $0x18] sm:$0xff]  ;;  %v114_v6 = vld [vmem:[#allocation7 + $0x20] sm:$0xff]  ;;  %s630_s0 = sshll.u32 %s1164_s5, 4  ;;  %s631_s0 = int_to_ptr.vmem [resolvable:$true] %s630_s0 }
  0x70   :  { %v891_v5 = vpack.c.bf16 %v113_v4, %v112_v2  ;;  %v115_v7 = vld [vmem:[#allocation7 + $0x28] sm:$0xff]  ;;  %v102_v9 = vld [vmem:[#allocation2] sm:$0xff]  ;;  %v116_v10 = vld [vmem:[#allocation7 + $0x30] sm:$0xff]  ;;  %s1124_s21 = scalar_lea.vmem %s631_s0, 1024  ;;  %p1129_p7 = scmp.lt.s32.totalorder %s631_s0, %s631_s0 }
  0x71   :  { %888 = vmatprep.subr.bf16.mxu0 %v887_v3  ;;  %v895_v8 = vpack.c.bf16 %v115_v7, %v114_v6  ;;  %v117_v11 = vld [vmem:[#allocation7 + $0x38] sm:$0xff]  ;;  %775 = vmatprep.mubr.f32.mxu0 %v102_v9  ;;  %v118_v13 = vld [vmem:[#allocation7 + $0x40] sm:$0xff]  ;;  %v119_v14 = vld [vmem:[#allocation7 + $0x48] sm:$0xff]  ;;  %p1125_p6 = scmp.ne.s32.totalorder %s631_s0, %s1124_s21  ;;  %p1130_p8 = scmp.lt.s32.totalorder %s1124_s21, %s1124_s21 }
  0x72   :  { %890 = vmatpush3.bf16.msra.mxu0 %v887_v3  ;;  %v899_v12 = vpack.c.bf16 %v117_v11, %v116_v10  ;;  %v903_v15 = vpack.c.bf16 %v119_v14, %v118_v13  ;;  %v120_v16 = vld [vmem:[#allocation7 + $0x50] sm:$0xff]  ;;  %v121_v17 = vld [vmem:[#allocation7 + $0x58] sm:$0xff]  ;;  %v122_v19 = vld [vmem:[#allocation7 + $0x60] sm:$0xff] }
  0x73   :  { %892 = vmatprep.subr.bf16.mxu0 %v891_v5  ;;  %v907_v18 = vpack.c.bf16 %v121_v17, %v120_v16  ;;  %v123_v20 = vld [vmem:[#allocation7 + $0x68] sm:$0xff]  ;;  %v124_v22 = vld [vmem:[#allocation7 + $0x70] sm:$0xff]  ;;  %v125_v23 = vld [vmem:[#allocation7 + $0x78] sm:$0xff]  ;;  %p1131_p9 = por %p1130_p8, %p1129_p7 }
  0x74   :  { %v911_v21 = vpack.c.bf16 %v123_v20, %v122_v19  ;;  %v915_v24 = vpack.c.bf16 %v125_v23, %v124_v22  ;;  %v103_v25 = vld [vmem:[#allocation2 + $0x8] sm:$0xff]  ;;  %v104_v26 = vld [vmem:[#allocation2 + $0x10] sm:$0xff]  ;;  %v105_v27 = vld [vmem:[#allocation2 + $0x18] sm:$0xff] }
  0x75   :  { %v106_v28 = vld [vmem:[#allocation2 + $0x20] sm:$0xff]  ;;  %v107_v29 = vld [vmem:[#allocation2 + $0x28] sm:$0xff]  ;;  %v108_v30 = vld [vmem:[#allocation2 + $0x30] sm:$0xff]  ;;  %p1132_p10 = pnand %p1131_p9, %p1125_p6 }
  0x76   :  { %894 = vmatpush3.bf16.msra.mxu0 %v891_v5  ;;  %v109_v31 = vld [vmem:[#allocation2 + $0x38] sm:$0xff]  ;;  %v231_v32 = vld [vmem:[#allocation5] sm:$0xff]  ;;  %v385_v43 = vld [vmem:[#allocation10 + $0x8] sm:$0xff] }
  0x77   :  { %896 = vmatprep.subr.bf16.mxu0 %v895_v8  ;;  %803 = vmatprep.mubr.msk.f32.mxu1 %vm246_vm0, %v231_v32  ;;  %v384_v42 = vld [vmem:[#allocation10] sm:$0xff]  ;;  %v386_v48 = vld [vmem:[#allocation10 + $0x10] sm:$0xff]  ;;  %v387_v49 = vld [vmem:[#allocation10 + $0x18] sm:$0xff] }
  0x78   :  { %v935_v47 = vpack.c.bf16 %v385_v43, %v384_v42  ;;  %v1301_v50 = vld [vmem:[#allocation5 + $0x8] sm:$0xff]  ;;  %v1303_v51 = vld [vmem:[#allocation5 + $0x10] sm:$0xff]  ;;  %v939_v52 = vpack.c.bf16 %v387_v49, %v386_v48  ;;  %v1309_v55 = vld [vmem:[#allocation5 + $0x18] sm:$0xff] }
  0x79   :  { %v388_v53 = vld [vmem:[#allocation10 + $0x20] sm:$0xff]  ;;  %v389_v54 = vld [vmem:[#allocation10 + $0x28] sm:$0xff]  ;;  %v390_v58 = vld [vmem:[#allocation10 + $0x30] sm:$0xff] }
  0x7a   :  { %898 = vmatpush3.bf16.msra.mxu0 %v895_v8  ;;  %v1311_v56 = vld [vmem:[#allocation5 + $0x20] sm:$0xff]  ;;  %v943_v57 = vpack.c.bf16 %v389_v54, %v388_v53  ;;  %v1317_v60 = vld [vmem:[#allocation5 + $0x28] sm:$0xff]  ;;  %v1319_v61 = vld [vmem:[#allocation5 + $0x30] sm:$0xff] }
  0x7b   :  { %900 = vmatprep.subr.bf16.mxu0 %v899_v12  ;;  %v391_v59 = vld [vmem:[#allocation10 + $0x38] sm:$0xff]  ;;  %v392_v63 = vld [vmem:[#allocation10 + $0x40] sm:$0xff]  ;;  %v393_v0 = vld [vmem:[#allocation10 + $0x48] sm:$0xff] }
  0x7c   :  { %v947_v62 = vpack.c.bf16 %v391_v59, %v390_v58  ;;  %v1325_v1 = vld [vmem:[#allocation5 + $0x38] sm:$0xff]  ;;  %v951_v2 = vpack.c.bf16 %v393_v0, %v392_v63  ;;  %v396_v6 = vld [vmem:[#allocation10 + $0x60] sm:$0xff]  ;;  %v397_v7 = vld [vmem:[#allocation10 + $0x68] sm:$0xff] }
  0x7d   :  { %v394_v3 = vld [vmem:[#allocation10 + $0x50] sm:$0xff]  ;;  %v395_v4 = vld [vmem:[#allocation10 + $0x58] sm:$0xff]  ;;  %v959_v8 = vpack.c.bf16 %v397_v7, %v396_v6  ;;  %v654_v49 = vld [vmem:[#allocation11] ss:$0 sm:$0xff] }
  0x7e   :  { %902 = vmatpush3.bf16.msra.mxu0 %v899_v12  ;;  %v955_v5 = vpack.c.bf16 %v395_v4, %v394_v3  ;;  %v398_v9 = vld [vmem:[#allocation10 + $0x70] sm:$0xff]  ;;  %v399_v10 = vld [vmem:[#allocation10 + $0x78] sm:$0xff] }
  0x7f   :  { %904 = vmatprep.subr.bf16.mxu0 %v903_v15  ;;  %v963_v11 = vpack.c.bf16 %v399_v10, %v398_v9  ;;  %v645_v12 = vld [vmem:[#allocation8] ss:$0 sm:$0xff] }
  0x82   :  { %906 = vmatpush3.bf16.msra.mxu0 %v903_v15 }
  0x83   :  { %908 = vmatprep.subr.bf16.mxu0 %v907_v18 }
  0x86   :  { %910 = vmatpush3.bf16.msra.mxu0 %v907_v18 }
  0x87   :  { %912 = vmatprep.subr.bf16.mxu0 %v911_v21 }
  0x8a   :  { %914 = vmatpush3.bf16.msra.mxu0 %v911_v21 }
  0x8b   :  { %916 = vmatprep.subr.bf16.mxu0 %v915_v24 }
  0x8e   :  { %918 = vmatpush3.bf16.msra.mxu0 %v915_v24 }
  0x91   :  { %776 = vmatmul.mubr.f32.vlgmr.msra.gmra.mrb[0].mxu0 %v103_v25 }
  0x92   :  { %778 = vmatprep.mubr.f32.mxu0 %v104_v26 }
  0x95   :  { %779 = vmatmul.mubr.f32.gmra.mrb[2].mxu0 %v105_v27 }
  0x96   :  { %781 = vmatprep.mubr.f32.mxu0 %v106_v28 }
  0x99   :  { %782 = vmatmul.mubr.f32.gmra.mrb[4].mxu0 %v107_v29 }
  0x9a   :  { %784 = vmatprep.mubr.f32.mxu0 %v108_v30 }
  0x9d   :  { %785 = vmatmul.mubr.f32.gmra.mrb[6].mxu0 %v109_v31 }
  0x9e   :  { %875 = vmatprep.mubr.msk.f32.mxu0 %vm246_vm0, %v231_v32 }
 0x164   :  { %v777_v33 = vpop.f32.mrb[0].mxu0 }
 0x165   :  { %v192_v34 = vpop.f32.mrb[1].mxu0 }
 0x166   :  { %v919_v35 = vpack.c.bf16 %v777_v33, %v192_v34 }
 0x168   :  { %v780_v36 = vpop.f32.mrb[2].mxu0  ;;  %920 = vmatprep.subr.bf16.mxu1 %v919_v35 }
 0x169   :  { %v202_v37 = vpop.f32.mrb[3].mxu0  ;;  %922 = vmatpush3.bf16.msra.mxu1 %v919_v35 }
 0x16a   :  { %v923_v38 = vpack.c.bf16 %v780_v36, %v202_v37 }
 0x16c   :  { %v783_v39 = vpop.f32.mrb[4].mxu0  ;;  %924 = vmatprep.subr.bf16.mxu1 %v923_v38 }
 0x16d   :  { %v212_v40 = vpop.f32.mrb[5].mxu0  ;;  %926 = vmatpush3.bf16.msra.mxu1 %v923_v38 }
 0x16e   :  { %v927_v41 = vpack.c.bf16 %v783_v39, %v212_v40 }
 0x170   :  { %v786_v44 = vpop.f32.mrb[6].mxu0  ;;  %928 = vmatprep.subr.bf16.mxu1 %v927_v41 }
 0x171   :  { %v222_v45 = vpop.f32.mrb[7].mxu0  ;;  %930 = vmatpush3.bf16.msra.mxu1 %v927_v41 }
 0x172   :  { %v931_v46 = vpack.c.bf16 %v786_v44, %v222_v45 }
 0x174   :  { %932 = vmatprep.subr.bf16.mxu1 %v931_v46 }
 0x175   :  { %934 = vmatpush3.bf16.msra.mxu1 %v931_v46 }
 0x176   :  { %936 = vmatprep.subr.bf16.mxu1 %v935_v47 }
 0x178   :  { %804 = vmatmul.mubr.msk.f32.vlgmr.msra.gmra.mrb[0].mxu1 %vm246_vm0, %v1301_v50 }
 0x179   :  { %806 = vmatprep.mubr.msk.f32.mxu1 %vm246_vm0, %v1303_v51  ;;  %938 = vmatpush3.bf16.msra.mxu1 %v935_v47 }
 0x17a   :  { %940 = vmatprep.subr.bf16.mxu1 %v939_v52 }
 0x17c   :  { %807 = vmatmul.mubr.msk.f32.gmra.mrb[2].mxu1 %vm246_vm0, %v1309_v55 }
 0x17d   :  { %809 = vmatprep.mubr.msk.f32.mxu1 %vm246_vm0, %v1311_v56  ;;  %942 = vmatpush3.bf16.msra.mxu1 %v939_v52 }
 0x17e   :  { %944 = vmatprep.subr.bf16.mxu1 %v943_v57 }
 0x180   :  { %810 = vmatmul.mubr.msk.f32.gmra.mrb[4].mxu1 %vm246_vm0, %v1317_v60 }
 0x181   :  { %812 = vmatprep.mubr.msk.f32.mxu1 %vm246_vm0, %v1319_v61  ;;  %946 = vmatpush3.bf16.msra.mxu1 %v943_v57 }
 0x182   :  { %948 = vmatprep.subr.bf16.mxu1 %v947_v62 }
 0x184   :  { %813 = vmatmul.mubr.msk.f32.gmra.mrb[6].mxu1 %vm246_vm0, %v1325_v1 }
 0x185   :  { %950 = vmatpush3.bf16.msra.mxu1 %v947_v62 }
 0x186   :  { %952 = vmatprep.subr.bf16.mxu1 %v951_v2 }
 0x189   :  { %954 = vmatpush3.bf16.msra.mxu1 %v951_v2 }
 0x18a   :  { %956 = vmatprep.subr.bf16.mxu1 %v955_v5 }
 0x18d   :  { %958 = vmatpush3.bf16.msra.mxu1 %v955_v5 }
 0x18e   :  { %960 = vmatprep.subr.bf16.mxu1 %v959_v8 }
 0x191   :  { %962 = vmatpush3.bf16.msra.mxu1 %v959_v8 }
 0x192   :  { %964 = vmatprep.subr.bf16.mxu1 %v963_v11 }
 0x195   :  { %966 = vmatpush3.bf16.msra.mxu1 %v963_v11 }
 0x24b   :  { %v805_v13 = vpop.f32.mrb[0].mxu1 }
 0x24c   :  { %v343_v14 = vadd.f32 %v805_v13, %v645_v12  ;;  %v337_v15 = vpop.f32.mrb[1].mxu1 }
 0x24d   :  { %v338_v16 = vadd.f32 %v645_v12, %v337_v15 }
 0x24e   :  { %v377_v19 = vmax.f32 %v343_v14, 0.0 }
 0x24f   :  { %v376_v17 = vmax.f32 %v338_v16, 0.0  ;;  %v808_v18 = vpop.f32.mrb[2].mxu1 }
 0x250   :  { %v353_v20 = vadd.f32 %v808_v18, %v645_v12  ;;  %v347_v21 = vpop.f32.mrb[3].mxu1 }
 0x251   :  { %v348_v22 = vadd.f32 %v645_v12, %v347_v21  ;;  %847 = vmatprep.mubr.f32.mxu1 %v376_v17 }
 0x252   :  { %848 = vmatmul.mubr.f32.vlgmr.msra.gmra.mrb[8].mxu1 %v377_v19  ;;  %v379_v25 = vmax.f32 %v353_v20, 0.0 }
 0x253   :  { %v378_v23 = vmax.f32 %v348_v22, 0.0  ;;  %v811_v24 = vpop.f32.mrb[4].mxu1 }
 0x254   :  { %v363_v26 = vadd.f32 %v811_v24, %v645_v12  ;;  %v357_v27 = vpop.f32.mrb[5].mxu1 }
 0x255   :  { %v358_v28 = vadd.f32 %v645_v12, %v357_v27  ;;  %850 = vmatprep.mubr.f32.mxu1 %v378_v23 }
 0x256   :  { %851 = vmatmul.mubr.f32.gmra.mrb[10].mxu1 %v379_v25  ;;  %v381_v31 = vmax.f32 %v363_v26, 0.0 }
 0x257   :  { %v380_v29 = vmax.f32 %v358_v28, 0.0  ;;  %v814_v30 = vpop.f32.mrb[6].mxu1 }
 0x258   :  { %v373_v32 = vadd.f32 %v814_v30, %v645_v12  ;;  %v367_v33 = vpop.f32.mrb[7].mxu1 }
 0x259   :  { %v368_v34 = vadd.f32 %v645_v12, %v367_v33  ;;  %853 = vmatprep.mubr.f32.mxu1 %v380_v29 }
 0x25a   :  { %854 = vmatmul.mubr.f32.gmra.mrb[12].mxu1 %v381_v31  ;;  %v383_v36 = vmax.f32 %v373_v32, 0.0 }
 0x25b   :  { %v382_v35 = vmax.f32 %v368_v34, 0.0 }
 0x25d   :  { %856 = vmatprep.mubr.f32.mxu1 %v382_v35 }
 0x25e   :  { %857 = vmatmul.mubr.f32.gmra.mrb[14].mxu1 %v383_v36 }
 0x325   :  { %v849_v37 = vpop.f32.mrb[8].mxu1 }
 0x326   :  { %v466_v38 = vpop.f32.mrb[9].mxu1 }
 0x327   :  { %v967_v39 = vpack.c.bf16 %v849_v37, %v466_v38 }
 0x329   :  { %v852_v40 = vpop.f32.mrb[10].mxu1  ;;  %968 = vmatprep.subr.bf16.mxu0 %v967_v39 }
 0x32a   :  { %v476_v41 = vpop.f32.mrb[11].mxu1  ;;  %970 = vmatpush3.bf16.msra.mxu0 %v967_v39 }
 0x32b   :  { %v971_v42 = vpack.c.bf16 %v852_v40, %v476_v41 }
 0x32d   :  { %v855_v43 = vpop.f32.mrb[12].mxu1  ;;  %972 = vmatprep.subr.bf16.mxu0 %v971_v42 }
 0x32e   :  { %v486_v44 = vpop.f32.mrb[13].mxu1  ;;  %974 = vmatpush3.bf16.msra.mxu0 %v971_v42 }
 0x32f   :  { %v975_v45 = vpack.c.bf16 %v855_v43, %v486_v44 }
 0x331   :  { %v858_v46 = vpop.f32.mrb[14].mxu1  ;;  %976 = vmatprep.subr.bf16.mxu0 %v975_v45 }
 0x332   :  { %v496_v47 = vpop.f32.mrb[15].mxu1  ;;  %978 = vmatpush3.bf16.msra.mxu0 %v975_v45 }
 0x333   :  { %v979_v48 = vpack.c.bf16 %v858_v46, %v496_v47 }
 0x335   :  { %980 = vmatprep.subr.bf16.mxu0 %v979_v48 }
 0x336   :  { %982 = vmatpush3.bf16.msra.mxu0 %v979_v48 }
 0x339   :  { %876 = vmatmul.mubr.msk.f32.vlgmr.msra.gmra.mrb[8].mxu0 %vm246_vm0, %v1301_v50 }
 0x33a   :  { %878 = vmatprep.mubr.msk.f32.mxu0 %vm246_vm0, %v1303_v51 }
 0x33d   :  { %879 = vmatmul.mubr.msk.f32.gmra.mrb[10].mxu0 %vm246_vm0, %v1309_v55 }
 0x33e   :  { %881 = vmatprep.mubr.msk.f32.mxu0 %vm246_vm0, %v1311_v56 }
 0x341   :  { %882 = vmatmul.mubr.msk.f32.gmra.mrb[12].mxu0 %vm246_vm0, %v1317_v60 }
 0x342   :  { %884 = vmatprep.mubr.msk.f32.mxu0 %vm246_vm0, %v1319_v61 }
 0x345   :  { %885 = vmatmul.mubr.msk.f32.gmra.mrb[14].mxu0 %vm246_vm0, %v1325_v1 }
 0x40c   :  { %v877_v50 = vpop.f32.mrb[8].mxu0 }
 0x40d   :  { %v584_v52 = vadd.f32 %v877_v50, %v654_v49  ;;  %v578_v53 = vpop.f32.mrb[9].mxu0 }
 0x40e   :  { %v579_v51 = vadd.f32 %v654_v49, %v578_v53 }
 0x40f   :  { %618 = vst [vmem:[#allocation13 + $0x8] sm:$0xff] %v584_v52 }
 0x410   :  { %617 = vst [vmem:[#allocation13] sm:$0xff] %v579_v51  ;;  %v880_v54 = vpop.f32.mrb[10].mxu0 }
 0x411   :  { %v594_v55 = vadd.f32 %v880_v54, %v654_v49  ;;  %v588_v57 = vpop.f32.mrb[11].mxu0 }
 0x412   :  { %v589_v56 = vadd.f32 %v654_v49, %v588_v57 }
 0x413   :  { %620 = vst [vmem:[#allocation13 + $0x18] sm:$0xff] %v594_v55 }
 0x414   :  { %619 = vst [vmem:[#allocation13 + $0x10] sm:$0xff] %v589_v56  ;;  %v883_v58 = vpop.f32.mrb[12].mxu0 }
 0x415   :  { %v604_v59 = vadd.f32 %v883_v58, %v654_v49  ;;  %v598_v60 = vpop.f32.mrb[13].mxu0 }
 0x416   :  { %v599_v61 = vadd.f32 %v654_v49, %v598_v60 }
 0x417   :  { %622 = vst [vmem:[#allocation13 + $0x28] sm:$0xff] %v604_v59 }
 0x418   :  { %621 = vst [vmem:[#allocation13 + $0x20] sm:$0xff] %v599_v61  ;;  %v886_v62 = vpop.f32.mrb[14].mxu0 }
 0x419   :  { %v614_v63 = vadd.f32 %v886_v62, %v654_v49  ;;  %v608_v0 = vpop.f32.mrb[15].mxu0 }
 0x41a   :  { %v609_v1 = vadd.f32 %v654_v49, %v608_v0 }
 0x41b   :  { %624 = vst [vmem:[#allocation13 + $0x38] sm:$0xff] %v614_v63 }
 0x41c   :  { %623 = vst [vmem:[#allocation13 + $0x30] sm:$0xff] %v609_v1 }
 0x41d   :  { %1135 = shalt.err (!%p1132_p10)
}
 0x41e   :  { %s1136_s25 = scalar_lea.hbm %s1364_s6, 1024 }
 0x41f   :  { %p1137_p11 = scmp.ne.s32.totalorder %s1364_s6, %s1136_s25  ;;  %p1140_p12 = scmp.lt.u32.totalorder %s1136_s25, %s1364_s6 }
 0x421   :  { %p1142_p13 = pnand %p1140_p12, %p1137_p11 }
 0x423   :  { %1145 = shalt.err (!%p1142_p13)
}
 0x424   :  { %636 = dma.vmem_to_hbm [thread:$0]  %s631_s0, 1024, %s1364_s6, [#allocation4], %s1158_s9, %s1158_s9, %s1159_s10  }
 0x425   :  { %1154 = dma.done.wait [#allocation4], 1024  }
 0x426   :  { %1155 = vsyncadd [#allocation4], 4294966272 }
 0x427   :  { %640 = vsyncpa [#allocation3], 1 }
 0x428   :  { %641 = vsyncpa [#allocation6], 1 }
 0x429   :  { %642 = vsyncpa [#allocation9], 1 }
 0x42a   :  { %643 = vsyncpa [#allocation12], 1 }
 0x42b   :  { %644 = vsyncpa [#allocation4], 1 }

</bundles_post_ra>
